<compile_context>
chip_gen: v5e
topology: v5e:2x2
jax: 0.10.0
libtpu: 0.0.40
codegen_flags: <defaults>
</compile_context>

<pallas_src>
import math

import jax
import jax.numpy as jnp
from jax.experimental import pallas as pl
from jax.experimental.pallas import tpu as pltpu


def _round_up(a, b):
    return -(-a // b) * b


def _mf_kernel(uu_ref, bias_ref, x_ref, o_ref, g_acc):
    # uu_ref:   (k, d, d)   UU[k,i,j] = U[k,i]*U[k,j]   (f32, replicated)
    # bias_ref: (1, k)      bias                         (f32, replicated)
    # x_ref:    (TB, d, TL) one tile of TB batch rows, TL spatial positions
    # o_ref:    (TB, k)     output rows for this batch tile
    # g_acc:    (TB, d, d)  f32 Gram accumulator (VMEM scratch)
    l = pl.program_id(1)

    @pl.when(l == 0)
    def _():
        g_acc[...] = jnp.zeros_like(g_acc)

    # Accumulate per-batch Gram: G_b += X_tile @ X_tile^T (contract over L).
    # Native dtype in, f32 accumulation on the MXU.
    x = x_ref[...]
    g_acc[...] += jnp.einsum("bdl,bel->bde", x, x,
                             preferred_element_type=jnp.float32)

    @pl.when(l == pl.num_programs(1) - 1)
    def _():
        g = g_acc[...]                                   # (TB, d, d) f32
        uu = uu_ref[...]                                 # (k, d, d)  f32
        # s[b, k'] = sum_{i,j} UU[k', i, j] * G[b, i, j]
        prod = g[:, None, :, :] * uu[None, :, :, :]      # (TB, k, d, d) -- tiny
        s = prod.sum(axis=-1).sum(axis=-1)               # (TB, k)
        o_ref[...] = s + bias_ref[...]                   # bias broadcasts over TB


def mf_forward(x, U, bias):
    """x: (B, d, H, W) or (B, d, L). U: (k, d). bias: (k,). Returns squeeze((B, k))."""
    B = x.shape[0]
    k, d = U.shape
    x_flat = x.reshape(B, d, -1)                         # (B, d, L)
    L = x_flat.shape[-1]

    # --- batch tiling -------------------------------------------------------
    if B <= 8:
        TB, B_pad = B, B                                 # block == full dim -> OK
    else:
        TB = 8
        B_pad = _round_up(B, TB)

    # --- L tiling (lane axis; contraction axis of the Gram matmul) ----------
    # Multiples of 256 feed the 256-deep MXU on v6e/v7x (also fine on v5e).
    # 2048-wide tiles keep the double-buffered x block tiny vs VMEM.
    TL_TARGET = 2048
    if L <= TL_TARGET:
        TL = _round_up(L, 256)
        L_pad = TL
    else:
        TL = TL_TARGET
        L_pad = _round_up(L, TL)

    if (B_pad, L_pad) != (B, L):
        # Zero padding contributes nothing to the Gram / sum of squares.
        x_flat = jnp.pad(x_flat, ((0, B_pad - B), (0, 0), (0, L_pad - L)))

    # Precompute UU[k,i,j] = U[k,i] * U[k,j] (tiny: k*d*d) so the in-kernel
    # finalize step is a trivial broadcast-multiply + reduce.
    uu = (U[:, :, None] * U[:, None, :]).astype(jnp.float32)   # (k, d, d)
    bias2d = bias.reshape(1, k).astype(jnp.float32)

    grid = (B_pad // TB, L_pad // TL)

    out = pl.pallas_call(
        _mf_kernel,
        out_shape=jax.ShapeDtypeStruct((B_pad, k), jnp.float32),
        grid_spec=pltpu.PrefetchScalarGridSpec(
            num_scalar_prefetch=0,
            grid=grid,
            in_specs=[
                pl.BlockSpec((k, d, d), lambda b, l: (0, 0, 0)),     # UU (replicated)
                pl.BlockSpec((1, k), lambda b, l: (0, 0)),           # bias (replicated)
                pl.BlockSpec((TB, d, TL), lambda b, l: (b, 0, l)),   # x tile
            ],
            out_specs=pl.BlockSpec((TB, k), lambda b, l: (b, 0)),    # resident over l
            scratch_shapes=[pltpu.VMEM((TB, d, d), jnp.float32)],
        ),
        compiler_params=pltpu.CompilerParams(
            dimension_semantics=("parallel", "arbitrary")),
    )(uu, bias2d, x_flat)

    out = out[:B]
    # torch.squeeze removes any size-1 dims (e.g. when B == 1 or k == 1).
    return jnp.squeeze(out)


def _reference(x, U, bias):
    B = x.shape[0]
    d = U.shape[1]
    x_flat = x.reshape(B, d, -1).astype(jnp.float32)
    z = jnp.einsum("kd,bdl->bkl", U.astype(jnp.float32), x_flat)
    s = jnp.sum(z * z, axis=2) + bias.astype(jnp.float32)[None, :]
    return jnp.squeeze(s)


if __name__ == "__main__":
    # Small shapes consistent with the module: k outputs, d input channels.
    B, d, H, W = 2, 4, 16, 16
    k = 8

    key = jax.random.PRNGKey(0)
    kx, ku, kb = jax.random.split(key, 3)

    # Deterministic parameter init matching reset_parameters():
    # uniform(-stdv, stdv) with stdv = 1/sqrt(d).
    stdv = 1.0 / math.sqrt(d)
    U = jax.random.uniform(ku, (k, d), jnp.float32, minval=-stdv, maxval=stdv)
    bias = jax.random.uniform(kb, (k,), jnp.float32, minval=-stdv, maxval=stdv)

    x = jax.random.normal(kx, (B, d, H, W), jnp.float32)

    out = mf_forward(x, U, bias)
    out = jax.block_until_ready(out)

    ref = _reference(x, U, bias)
    assert out.shape == ref.shape, (out.shape, ref.shape)
    assert jnp.allclose(out, ref, atol=1e-3, rtol=1e-4), "mismatch vs reference"

    print("KERNEL_OK")
</pallas_src>

<mosaic_0001>
module attributes {stable_mosaic.version = 11 : i64} {
  func.func @_mf_kernel(%arg0: i32, %arg1: i32, %arg2: memref<8x4x4xf32, #tpu.memory_space<vmem>>, %arg3: memref<1x8xf32, #tpu.memory_space<vmem>>, %arg4: memref<2x4x256xf32, #tpu.memory_space<vmem>>, %arg5: memref<2x8xf32, #tpu.memory_space<vmem>>, %arg6: memref<2x4x4xf32, #tpu.memory_space<vmem>>) attributes {dimension_semantics = [#tpu.dimension_semantics<parallel>, #tpu.dimension_semantics<arbitrary>], iteration_bounds = array<i64: 1, 1>, scalar_prefetch = 0 : i64, scratch_operands = 1 : i64, tpu.core_type = #tpu.core_type<tc>, window_params = [{pipeline_mode = #tpu.pipeline_mode<synchronous>, transform_indices = @transform_0, window_bounds = array<i64: 8, 4, 4>}, {pipeline_mode = #tpu.pipeline_mode<synchronous>, transform_indices = @transform_1, window_bounds = array<i64: 1, 8>}, {transform_indices = @transform_2, window_bounds = array<i64: 2, 4, 256>}, {transform_indices = @transform_3, window_bounds = array<i64: 2, 8>}]} {
    %c0_i32 = arith.constant 0 : i32
    %0 = arith.cmpi eq, %arg1, %c0_i32 : i32
    %1 = arith.extui %0 : i1 to i32
    %c0_i32_0 = arith.constant 0 : i32
    %2 = arith.cmpi ne, %1, %c0_i32_0 : i32
    scf.if %2 {
      %cst_11 = arith.constant 0.000000e+00 : f32
      %11 = vector.broadcast %cst_11 : f32 to vector<2x4x4xf32>
      %c0_12 = arith.constant 0 : index
      %c0_13 = arith.constant 0 : index
      %c0_14 = arith.constant 0 : index
      %12 = vector.load %arg6[%c0_12, %c0_13, %c0_14] : memref<2x4x4xf32, #tpu.memory_space<vmem>>, vector<2x4x4xf32>
      tpu.vector_store %arg6[%c0_12, %c0_13, %c0_14], %11 {strides = array<i32>} : memref<2x4x4xf32, #tpu.memory_space<vmem>>, vector<2x4x4xf32>,
    } else {
    }
    %c0 = arith.constant 0 : index
    %c0_1 = arith.constant 0 : index
    %c0_2 = arith.constant 0 : index
    %3 = vector.load %arg4[%c0, %c0_1, %c0_2] : memref<2x4x256xf32, #tpu.memory_space<vmem>>, vector<2x4x256xf32>
    %c0_3 = arith.constant 0 : index
    %c0_4 = arith.constant 0 : index
    %c0_5 = arith.constant 0 : index
    %4 = vector.load %arg6[%c0_3, %c0_4, %c0_5] : memref<2x4x4xf32, #tpu.memory_space<vmem>>, vector<2x4x4xf32>
    "tpu.trace_start"() <{level = 10 : i32, message = "bdl,bel->bde"}> : () -> ()
    %cst = arith.constant dense<0.000000e+00> : vector<2x4x4xf32>
    %5 = tpu.matmul %3, %3, %cst {dimension_numbers = #tpu.dot_dimension_numbers<[2], [2], [1], [1], [0, 0, 0, 1, 1, 1], [0], [0]>} : vector<2x4x256xf32>, vector<2x4x256xf32>, vector<2x4x4xf32> -> vector<2x4x4xf32>
    "tpu.trace_stop"() : () -> ()
    %6 = arith.addf %4, %5 : vector<2x4x4xf32>
    %c0_6 = arith.constant 0 : index
    %c0_7 = arith.constant 0 : index
    %c0_8 = arith.constant 0 : index
    %7 = vector.load %arg6[%c0_6, %c0_7, %c0_8] : memref<2x4x4xf32, #tpu.memory_space<vmem>>, vector<2x4x4xf32>
    tpu.vector_store %arg6[%c0_6, %c0_7, %c0_8], %6 {strides = array<i32>} : memref<2x4x4xf32, #tpu.memory_space<vmem>>, vector<2x4x4xf32>,
    %c0_i32_9 = arith.constant 0 : i32
    %8 = arith.cmpi eq, %arg1, %c0_i32_9 : i32
    %9 = arith.extui %8 : i1 to i32
    %c0_i32_10 = arith.constant 0 : i32
    %10 = arith.cmpi ne, %9, %c0_i32_10 : i32
    scf.if %10 {
      %c0_11 = arith.constant 0 : index
      %c0_12 = arith.constant 0 : index
      %c0_13 = arith.constant 0 : index
      %11 = vector.load %arg6[%c0_11, %c0_12, %c0_13] : memref<2x4x4xf32, #tpu.memory_space<vmem>>, vector<2x4x4xf32>
      %c0_14 = arith.constant 0 : index
      %c0_15 = arith.constant 0 : index
      %c0_16 = arith.constant 0 : index
      %12 = vector.load %arg2[%c0_14, %c0_15, %c0_16] : memref<8x4x4xf32, #tpu.memory_space<vmem>>, vector<8x4x4xf32>
      %13 = vector.shape_cast %11 : vector<2x4x4xf32> to vector<2x1x4x4xf32>
      %14 = vector.shape_cast %12 : vector<8x4x4xf32> to vector<1x8x4x4xf32>
      %15 = vector.broadcast %13 : vector<2x1x4x4xf32> to vector<2x8x4x4xf32>
      %16 = vector.broadcast %14 : vector<1x8x4x4xf32> to vector<2x8x4x4xf32>
      %17 = arith.mulf %15, %16 : vector<2x8x4x4xf32>
      %cst_17 = arith.constant dense<0.000000e+00> : vector<2x8x4xf32>
      %18 = vector.multi_reduction <add>, %17, %cst_17 [3] : vector<2x8x4x4xf32> to vector<2x8x4xf32>
      %cst_18 = arith.constant dense<0.000000e+00> : vector<2x8xf32>
      %19 = vector.multi_reduction <add>, %18, %cst_18 [2] : vector<2x8x4xf32> to vector<2x8xf32>
      %c0_19 = arith.constant 0 : index
      %c0_20 = arith.constant 0 : index
      %20 = vector.load %arg3[%c0_19, %c0_20] : memref<1x8xf32, #tpu.memory_space<vmem>>, vector<1x8xf32>
      %21 = vector.broadcast %20 : vector<1x8xf32> to vector<2x8xf32>
      %22 = arith.addf %19, %21 : vector<2x8xf32>
      %c0_21 = arith.constant 0 : index
      %c0_22 = arith.constant 0 : index
      %23 = vector.load %arg5[%c0_21, %c0_22] : memref<2x8xf32, #tpu.memory_space<vmem>>, vector<2x8xf32>
      tpu.vector_store %arg5[%c0_21, %c0_22], %22 {strides = array<i32>} : memref<2x8xf32, #tpu.memory_space<vmem>>, vector<2x8xf32>,
    } else {
    }
    return
  }
  func.func @transform_0(%arg0: i32, %arg1: i32) -> (i32, i32, i32) {
    %c0_i32 = arith.constant 0 : i32
    %c0_i32_0 = arith.constant 0 : i32
    %c0_i32_1 = arith.constant 0 : i32
    %c0_i32_2 = arith.constant 0 : i32
    return %c0_i32, %c0_i32_0, %c0_i32_1 : i32, i32, i32
  }
  func.func @transform_1(%arg0: i32, %arg1: i32) -> (i32, i32) {
    %c0_i32 = arith.constant 0 : i32
    %c0_i32_0 = arith.constant 0 : i32
    %c0_i32_1 = arith.constant 0 : i32
    return %c0_i32, %c0_i32_0 : i32, i32
  }
  func.func @transform_2(%arg0: i32, %arg1: i32) -> (i32, i32, i32) {
    %c0_i32 = arith.constant 0 : i32
    %c0_i32_0 = arith.constant 0 : i32
    return %arg0, %c0_i32, %arg1 : i32, i32, i32
  }
  func.func @transform_3(%arg0: i32, %arg1: i32) -> (i32, i32) {
    %c0_i32 = arith.constant 0 : i32
    %c0_i32_0 = arith.constant 0 : i32
    return %arg0, %c0_i32 : i32, i32
  }
}

</mosaic_0001>

<bundles_post_ra>
// kernel: tpu_custom_call.1
= control target key start
LH: loop header
LB: loop body
LE: loop exit
PB: predicated region body
PF: predicated region fallthrough
CT: control target
= control target key end

     0   :  { %s466_s0 = inlined_call_operand.vmem [shape: f32[8,4,4], index: 0, kind: input, shape index: {}]   ;;  %s467_s1 = inlined_call_operand.vmem [shape: f32[1,8], index: 1, kind: input, shape index: {}]   ;;  %s468_s2 = inlined_call_operand.vmem [shape: f32[2,4,256], index: 2, kind: input, shape index: {}]   ;;  %s469_s3 = inlined_call_operand.hbm [shape: f32[2,8], index: 3, kind: output, shape index: {}]  }
   0x1   :  { %v22_v0 = vld [vmem:[%s468_s2] sm:$0xff] }
   0x2   :  { %27 = vst [vmem:[#allocation1] ss:$2 sm:$0xff] %v22_v0 }
   0x3   :  { %8 = vsyncpa [#allocation4], 0  ;;  %v23_v3 = vld [vmem:[%s468_s2 + $0x8] sm:$0xff]  ;;  %vm19_vm0 = vcmask 27648   ;;  %v350_v10 = vmov 0.0   ;;  %v226_v63 = vlaneseq  ;;  %vm244_vm1 = vcmask 1041409  }
   0x4   :  { %20 = vst.msk [vmem:[#allocation2] sm:$0xf] %vm19_vm0, %v350_v10  ;;  %v140_v16 = vld [vmem:[%s466_s0 + $0x8] sm:$0xf]  ;;  %v138_v17 = vld [vmem:[%s466_s0] sm:$0xf] }
   0x5   :  { %21 = vst.msk [vmem:[#allocation2 + $0x4] sm:$0xf] %vm19_vm0, %v350_v10  ;;  %v143_v18 = vld [vmem:[%s466_s0 + $0x14] sm:$0xf]  ;;  %v142_v26 = vld [vmem:[%s466_s0 + $0x10] sm:$0xf] }
   0x6   :  { %v139_v27 = vld [vmem:[%s466_s0 + $0x4] sm:$0xf]  ;;  %v141_v36 = vld [vmem:[%s466_s0 + $0xc] sm:$0xf]  ;;  %v144_v40 = vld [vmem:[%s466_s0 + $0x18] sm:$0xf] }
   0x7   :  { %v145_v53 = vld [vmem:[%s466_s0 + $0x1c] sm:$0xf]  ;;  %v426_v10 = vand.u32 127, %v226_v63  ;;  %vm246_vm2 = vcmask 1042434   ;;  %vm248_vm3 = vcmask 1043459   ;;  %vm250_vm4 = vcmask 1044484  }
   0x8   :  { %vm252_vm5 = vcmask 1045509   ;;  %vm254_vm6 = vcmask 1046534   ;;  %vm256_vm7 = vcmask 1047559   ;;  %vm267_vm8 = vcmask 31744   ;;  %s307_s8 = sshll.u32 %s469_s3, 4  ;;  %s308_s8 = int_to_ptr.hbm [resolvable:$true] %s307_s8 }
   0x9   :  { %v28_v1 = vld.sshfl [vmem:[#allocation1] sm:$0xff pattern:$0x75316420]  ;;  %v29_v2 = vld.sshfl [vmem:[#allocation1 + $0x8] sm:$0xff pattern:$0x75316420] }
   0xa   :  { %32 = vst [vmem:[#allocation1] ss:$2 sm:$0xff] %v22_v0  ;;  %vm298_vm9 = vcmask 58368  }
   0xb   :  { %v24_v12 = vld [vmem:[#allocation2] sm:$0xf] }
   0xc   :  { %v25_v31 = vld [vmem:[#allocation2 + $0x4] sm:$0xf] }
  0x11   :  { %v33_v4 = vld.sshfl [vmem:[#allocation1] sm:$0xff pattern:$0x75316420]  ;;  %v34_v5 = vld.sshfl [vmem:[#allocation1 + $0x8] sm:$0xff pattern:$0x75316420] }
  0x12   :  { %52 = vmatpush.xpose.msra.mxu0 %v33_v4  ;;  %72 = vmatpush.xpose.msra.mxu1 %v34_v5  ;;  %78 = vst [vmem:[#allocation1] ss:$2 sm:$0xff] %v23_v3  ;;  %v323_v4 = vld [vmem:[%s467_s1] ss:$0 sm:$0xff]  ;;  %s352_s1 = smov [#allocation3]  }
  0x13   :  { %s305_s5 = sshll.u32 %s352_s1, 4  ;;  %s306_s5 = int_to_ptr.vmem [resolvable:$true] %s305_s5 }
  0x15   :  { %53 = vmatmul.f32.vlgmr.msra.gmra.mxu0 %v28_v1  ;;  %73 = vmatmul.f32.vlgmr.msra.gmra.mxu1 %v29_v2  ;;  %v278_v1 = vshrl.u32 %v226_v63, 7 }
  0x17   :  { %319 = vset.pattern.permute.xlu0 %v278_v1 }
  0x19   :  { %v79_v6 = vld.sshfl [vmem:[#allocation1] sm:$0xff pattern:$0x75316420]  ;;  %v80_v7 = vld.sshfl [vmem:[#allocation1 + $0x8] sm:$0xff pattern:$0x75316420] }
  0x1a   :  { %83 = vst [vmem:[#allocation1] ss:$2 sm:$0xff] %v23_v3 }
  0x21   :  { %v84_v8 = vld.sshfl [vmem:[#allocation1] sm:$0xff pattern:$0x75316420]  ;;  %v85_v9 = vld.sshfl [vmem:[#allocation1 + $0x8] sm:$0xff pattern:$0x75316420] }
  0x22   :  { %103 = vmatpush.xpose.msra.mxu2 %v84_v8  ;;  %123 = vmatpush.xpose.msra.mxu3 %v85_v9 }
  0x25   :  { %104 = vmatmul.f32.vlgmr.msra.gmra.mxu2 %v79_v6  ;;  %124 = vmatmul.f32.vlgmr.msra.gmra.mxu3 %v80_v7 }
  0x92   :  { %v54_v11 = vpop.f32.mrf.mxu0  ;;  %v74_v13 = vpop.f32.mrf.mxu1 }
  0x93   :  { %v75_v14 = vadd.f32 %v74_v13, %v54_v11 }
  0x95   :  { %v128_v15 = vadd.f32 %v75_v14, %v24_v12 }
  0x97   :  { %131 = vst.msk [vmem:[#allocation2] sm:$0xf] %vm19_vm0, %v128_v15 }
  0x9e   :  { %v136_v19 = vld [vmem:[#allocation2] sm:$0xf] }
  0x9f   :  { %v148_v20 = vmul.f32 %v140_v16, %v136_v19  ;;  %v146_v21 = vmul.f32 %v138_v17, %v136_v19  ;;  %v151_v22 = vmul.f32 %v143_v18, %v136_v19  ;;  %v150_v28 = vmul.f32 %v142_v26, %v136_v19 }
  0xa0   :  { %v147_v29 = vmul.f32 %v139_v27, %v136_v19  ;;  %v149_v38 = vmul.f32 %v141_v36, %v136_v19  ;;  %v152_v44 = vmul.f32 %v144_v40, %v136_v19  ;;  %v153_v56 = vmul.f32 %v145_v53, %v136_v19 }
  0xa1   :  { %v168_v23 = vsel %vm19_vm0, %v148_v20, 0.0  ;;  %v162_v24 = vsel %vm19_vm0, %v146_v21, 0.0  ;;  %v177_v25 = vsel %vm19_vm0, %v151_v22, 0.0  ;;  %v174_v34 = vsel %vm19_vm0, %v150_v28, 0.0 }
  0xa2   :  { %169 = vadd.xlane.f32.xlu2 %v168_v23  ;;  %163 = vadd.xlane.f32.xlu0 %v162_v24  ;;  %v165_v35 = vsel %vm19_vm0, %v147_v29, 0.0  ;;  %v171_v39 = vsel %vm19_vm0, %v149_v38, 0.0  ;;  %v180_v47 = vsel %vm19_vm0, %v152_v44, 0.0  ;;  %v183_v59 = vsel %vm19_vm0, %v153_v56, 0.0 }
  0xa3   :  { %178 = vadd.xlane.f32.xlu1 %v177_v25 }
  0xa8   :  { %v105_v30 = vpop.f32.mrf.mxu2  ;;  %v125_v32 = vpop.f32.mrf.mxu3 }
  0xa9   :  { %v126_v33 = vadd.f32 %v125_v32, %v105_v30 }
  0xaa   :  { %175 = vadd.xlane.f32.xlu2 %v174_v34  ;;  %166 = vadd.xlane.f32.xlu0 %v165_v35 }
  0xab   :  { %v129_v37 = vadd.f32 %v126_v33, %v25_v31 }
  0xad   :  { %132 = vst.msk [vmem:[#allocation2 + $0x4] sm:$0xf] %vm19_vm0, %v129_v37 }
  0xb2   :  { %172 = vadd.xlane.f32.xlu0 %v171_v39 }
  0xb4   :  { %v137_v41 = vld [vmem:[#allocation2 + $0x4] sm:$0xf] }
  0xb5   :  { %v154_v42 = vmul.f32 %v138_v17, %v137_v41  ;;  %v156_v43 = vmul.f32 %v140_v16, %v137_v41  ;;  %v155_v48 = vmul.f32 %v139_v27, %v137_v41  ;;  %v159_v49 = vmul.f32 %v143_v18, %v137_v41 }
  0xb6   :  { %v158_v50 = vmul.f32 %v142_v26, %v137_v41  ;;  %v157_v55 = vmul.f32 %v141_v36, %v137_v41  ;;  %v161_v57 = vmul.f32 %v145_v53, %v137_v41  ;;  %v160_v61 = vmul.f32 %v144_v40, %v137_v41 }
  0xb7   :  { %v186_v45 = vsel %vm19_vm0, %v154_v42, 0.0  ;;  %v192_v46 = vsel %vm19_vm0, %v156_v43, 0.0  ;;  %v189_v51 = vsel %vm19_vm0, %v155_v48, 0.0  ;;  %v201_v52 = vsel %vm19_vm0, %v159_v49, 0.0 }
  0xb8   :  { %187 = vadd.xlane.f32.xlu1 %v186_v45  ;;  %193 = vadd.xlane.f32.xlu2 %v192_v46  ;;  %v198_v54 = vsel %vm19_vm0, %v158_v50, 0.0  ;;  %v195_v58 = vsel %vm19_vm0, %v157_v55, 0.0  ;;  %v207_v60 = vsel %vm19_vm0, %v161_v57, 0.0  ;;  %v204_v62 = vsel %vm19_vm0, %v160_v61, 0.0 }
  0xba   :  { %181 = vadd.xlane.f32.xlu0 %v180_v47 }
  0xc0   :  { %190 = vadd.xlane.f32.xlu1 %v189_v51  ;;  %202 = vadd.xlane.f32.xlu2 %v201_v52  ;;  %v351_v51 = vmov 0  }
  0xc1   :  { %320 = vset.pattern.permute.xlu1 %v351_v51  ;;  %321 = vset.pattern.permute.xlu2 %v351_v51 }
  0xc2   :  { %199 = vadd.xlane.f32.xlu0 %v198_v54 }
  0xc8   :  { %196 = vadd.xlane.f32.xlu1 %v195_v58  ;;  %184 = vadd.xlane.f32.xlu2 %v183_v59 }
  0xca   :  { %208 = vadd.xlane.f32.xlu0 %v207_v60 }
  0xd0   :  { %205 = vadd.xlane.f32.xlu1 %v204_v62 }
  0xde   :  { %281 = vperm.xlu0 %319, %v323_v4  }
  0xe6   :  { %322 = vset.pattern.permute.xlu0 %v351_v51 }
 0x115   :  { %v164_v0 = vpop.xlane.xlu0 %163  ;;  %v170_v2 = vpop.xlane.xlu2 %169 }
 0x116   :  { %v179_v5 = vpop.xlane.xlu1 %178  ;;  %v228_v13 = vperm.slane %v164_v0, %v426_v10  ;;  %v230_v16 = vperm.slane %v170_v2, %v426_v10 }
 0x117   :  { %v233_v27 = vperm.slane %v179_v5, %v426_v10 }
 0x11d   :  { %v167_v3 = vpop.xlane.xlu0 %166  ;;  %v176_v6 = vpop.xlane.xlu2 %175 }
 0x11e   :  { %v229_v11 = vperm.slane %v167_v3, %v426_v10  ;;  %v232_v21 = vperm.slane %v176_v6, %v426_v10 }
 0x120   :  { %v245_v14 = vsel %vm244_vm1, %v229_v11, %v228_v13 }
 0x121   :  { %v247_v19 = vsel %vm246_vm2, %v230_v16, %v245_v14 }
 0x125   :  { %v173_v7 = vpop.xlane.xlu0 %172 }
 0x126   :  { %v231_v15 = vperm.slane %v173_v7, %v426_v10 }
 0x128   :  { %v249_v20 = vsel %vm248_vm3, %v231_v15, %v247_v19 }
 0x129   :  { %v251_v24 = vsel %vm250_vm4, %v232_v21, %v249_v20 }
 0x12a   :  { %v253_v34 = vsel %vm252_vm5, %v233_v27, %v251_v24 }
 0x12b   :  { %v188_v8 = vpop.xlane.xlu1 %187  ;;  %v194_v9 = vpop.xlane.xlu2 %193 }
 0x12c   :  { %v236_v25 = vperm.slane %v188_v8, %v426_v10  ;;  %v238_v31 = vperm.slane %v194_v9, %v426_v10 }
 0x12d   :  { %v182_v12 = vpop.xlane.xlu0 %181 }
 0x12e   :  { %v234_v26 = vperm.slane %v182_v12, %v426_v10 }
 0x130   :  { %v255_v35 = vsel %vm254_vm6, %v234_v26, %v253_v34 }
 0x133   :  { %v191_v17 = vpop.xlane.xlu1 %190  ;;  %v203_v18 = vpop.xlane.xlu2 %202 }
 0x134   :  { %v237_v22 = vperm.slane %v191_v17, %v426_v10  ;;  %v241_v43 = vperm.slane %v203_v18, %v426_v10 }
 0x135   :  { %v200_v23 = vpop.xlane.xlu0 %199 }
 0x136   :  { %v258_v28 = vsel %vm244_vm1, %v237_v22, %v236_v25  ;;  %v240_v40 = vperm.slane %v200_v23, %v426_v10 }
 0x137   :  { %v259_v36 = vsel %vm246_vm2, %v238_v31, %v258_v28 }
 0x13b   :  { %v197_v29 = vpop.xlane.xlu1 %196  ;;  %v185_v30 = vpop.xlane.xlu2 %184 }
 0x13c   :  { %v239_v32 = vperm.slane %v197_v29, %v426_v10  ;;  %v235_v33 = vperm.slane %v185_v30, %v426_v10 }
 0x13d   :  { %v209_v42 = vpop.xlane.xlu0 %208 }
 0x13e   :  { %v257_v37 = vsel %vm256_vm7, %v235_v33, %v255_v35  ;;  %v260_v38 = vsel %vm248_vm3, %v239_v32, %v259_v36  ;;  %v243_v46 = vperm.slane %v209_v42, %v426_v10 }
 0x13f   :  { %v268_v39 = vsel %vm267_vm8, %v257_v37, 0.0  ;;  %v261_v41 = vsel %vm250_vm4, %v240_v40, %v260_v38 }
 0x140   :  { %269 = vadd.xlane.f32.xlu1 %v268_v39  ;;  %v262_v47 = vsel %vm252_vm5, %v241_v43, %v261_v41 }
 0x143   :  { %v206_v44 = vpop.xlane.xlu1 %205 }
 0x144   :  { %v242_v45 = vperm.slane %v206_v44, %v426_v10 }
 0x146   :  { %v263_v48 = vsel %vm254_vm6, %v242_v45, %v262_v47 }
 0x147   :  { %v264_v49 = vsel %vm256_vm7, %v243_v46, %v263_v48 }
 0x148   :  { %v271_v50 = vsel %vm267_vm8, %v264_v49, 0.0 }
 0x149   :  { %272 = vadd.xlane.f32.xlu2 %v271_v50 }
 0x150   :  { %v282_v52 = vpop.permute.xlu0 %281 }
 0x1b3   :  { %v270_v53 = vpop.xlane.xlu1 %269 }
 0x1b4   :  { %v284_v54 = vadd.f32 %v282_v52, %v270_v53 }
 0x1b6   :  { %289 = vperm.xlu1 %320, %v284_v54  }
 0x1bc   :  { %v273_v55 = vpop.xlane.xlu2 %272 }
 0x1bd   :  { %v285_v56 = vadd.f32 %v282_v52, %v273_v55 }
 0x1bf   :  { %292 = vperm.xlu2 %321, %v285_v56  }
 0x219   :  { %v293_v57 = vpop.permute.xlu2 %292 }
 0x21a   :  { %v295_v59 = vperm.slane %v293_v57, %v426_v10 }
 0x228   :  { %v290_v58 = vpop.permute.xlu1 %289 }
 0x229   :  { %v294_v60 = vperm.slane %v290_v58, %v426_v10 }
 0x22b   :  { %v296_v61 = vsel %vm244_vm1, %v295_v59, %v294_v60 }
 0x22c   :  { %299 = vst.msk [vmem:[#allocation3] sm:$0x3] %vm298_vm9, %v296_v61 }
 0x22d   :  { %310 = dma.vmem_to_hbm [thread:$0]  %s306_s5, 32, %s308_s8, [#allocation4]  }
 0x22e   :  { %348 = dma.done.wait [#allocation4], 32  }
 0x22f   :  { %349 = vsyncadd [#allocation4], 4294967264 }
 0x230   :  { %315 = vsyncpa [#allocation4], 1 }

</bundles_post_ra>
